<compile_context>
chip_gen: v5e
topology: v5e:2x2
jax: 0.10.0
libtpu: 0.0.40
codegen_flags: <defaults>
</compile_context>

<pallas_src>
import functools

import jax
import jax.numpy as jnp
from jax.experimental import pallas as pl
from jax.experimental.pallas import tpu as pltpu


def linear_autoencoder_kernel(xf_ref, w_ref, out_ref):
    """Single MXU matmul: out = x_flat @ W (f32 accumulation)."""
    out_ref[...] = jnp.dot(
        xf_ref[...], w_ref[...], preferred_element_type=jnp.float32
    ).astype(out_ref.dtype)


def fold_weights(a_w, b_w, c_w, seq_len, d_in):
    """Fold the full recurrence into one (T*D, T*D) matrix, in float32.

    Call this ONCE per weight update (it is weights-only work) and reuse the
    result for every forward call.

      x_dec_flat = x_flat @ W
      W = W_enc^T @ W_dec
      W_enc^T[i*D:(i+1)*D, :] = (B^{T-1-i} A)^T          (T*D, H)
      W_dec[:, i*D:(i+1)*D]   = (C_x C_y^{T-1-i})^T      (H, T*D)
    """
    a_w = a_w.astype(jnp.float32)
    b_w = b_w.astype(jnp.float32)
    c_w = c_w.astype(jnp.float32)

    c_x = c_w[:d_in, :]   # (D_in, H)
    c_y = c_w[d_in:, :]   # (H, H)

    enc_blocks = [None] * seq_len
    dec_blocks = [None] * seq_len
    enc_cur = a_w.T        # (D_in, H) == (B^0 A)^T
    dec_cur = c_x.T        # (H, D_in) == (C_x C_y^0)^T
    for k in range(seq_len):
        i = seq_len - 1 - k
        enc_blocks[i] = enc_cur
        dec_blocks[i] = dec_cur
        if k + 1 < seq_len:
            enc_cur = enc_cur @ b_w.T        # (B^{k+1} A)^T
            dec_cur = c_y.T @ dec_cur        # (C_x C_y^{k+1})^T

    w_enc_t = jnp.concatenate(enc_blocks, axis=0)   # (T*D, H)
    w_dec = jnp.concatenate(dec_blocks, axis=1)     # (H, T*D)
    return w_enc_t @ w_dec                          # (T*D, T*D)


@functools.partial(jax.jit, static_argnames=("seq_len", "d_in"))
def linear_autoencoder(x, w_folded, *, seq_len, d_in):
    """Forward pass using a pre-folded weight matrix (see fold_weights)."""
    bsz = x.shape[0]
    td = seq_len * d_in
    assert d_in == 3, "module hardcodes the [:, :3] / [:, 3:] split"
    assert x.shape == (bsz, seq_len, d_in)
    assert w_folded.shape == (td, td)

    x_flat = x.reshape(bsz, td)

    # Row-tile over batch only; keep the (small) last dim un-tiled for
    # contiguous, lane-dense DMA.  TM is 8-aligned (or the full batch).
    if bsz <= 1024:
        tm = bsz
    else:
        tm = 1024
    grid = (pl.cdiv(bsz, tm),)

    cost = pl.CostEstimate(
        flops=2 * bsz * td * td,
        transcendentals=0,
        bytes_accessed=(x_flat.dtype.itemsize * bsz * td      # x
                        + x_flat.dtype.itemsize * bsz * td    # out
                        + 4 * td * td),                       # W (f32)
    )

    out_flat = pl.pallas_call(
        linear_autoencoder_kernel,
        out_shape=jax.ShapeDtypeStruct((bsz, td), x.dtype),
        grid_spec=pltpu.PrefetchScalarGridSpec(
            num_scalar_prefetch=0,
            grid=grid,
            in_specs=[
                pl.BlockSpec((tm, td), lambda i: (i, 0)),   # x tile
                pl.BlockSpec((td, td), lambda i: (0, 0)),   # folded W, resident
            ],
            out_specs=pl.BlockSpec((tm, td), lambda i: (i, 0)),
        ),
        compiler_params=pltpu.CompilerParams(
            dimension_semantics=("parallel",),
        ),
        cost_estimate=cost,
    )(x_flat, w_folded)

    return out_flat.reshape(bsz, seq_len, d_in)


def reference_forward(x, a_w, b_w, c_w):
    """Pure-JAX replica of the PyTorch forward (loop form) for verification."""
    bsz, seq_len, d_in = x.shape
    hidden = a_w.shape[0]
    y = jnp.zeros((bsz, hidden), dtype=jnp.float32)
    for i in range(seq_len):
        y = x[:, i, :] @ a_w.T + y @ b_w.T
    x_dec = jnp.zeros_like(x)
    for i in range(seq_len - 1, -1, -1):
        out = y @ c_w.T
        x_dec = x_dec.at[:, i, :].set(out[:, :d_in])
        y = out[:, d_in:]
    return x_dec


if __name__ == "__main__":
    batch = 2
    seq = 8
    dim_input = 3     # forced by the hardcoded `[:, :3]` split in the module
    dim_hidden = 32

    key = jax.random.PRNGKey(0)
    kx, ka, kb, kc = jax.random.split(key, 4)

    x = jax.random.normal(kx, (batch, seq, dim_input), dtype=jnp.float32)

    # Deterministic PyTorch-Linear-style init: U(-1/sqrt(in), 1/sqrt(in)).
    def linear_init(k, out_f, in_f):
        bound = 1.0 / jnp.sqrt(jnp.float32(in_f))
        return jax.random.uniform(k, (out_f, in_f), jnp.float32, -bound, bound)

    a_w = linear_init(ka, dim_hidden, dim_input)                 # A: in -> hidden
    b_w = linear_init(kb, dim_hidden, dim_hidden)                # B: hidden -> hidden
    c_w = linear_init(kc, dim_input + dim_hidden, dim_hidden)    # C: hidden -> in+hidden

    # Fold ONCE (weights-only cost), reuse for every forward call.
    w_folded = jax.block_until_ready(fold_weights(a_w, b_w, c_w, seq, dim_input))

    out = linear_autoencoder(x, w_folded, seq_len=seq, d_in=dim_input)
    out = jax.block_until_ready(out)

    ref = reference_forward(x, a_w, b_w, c_w)
    assert out.shape == x.shape and out.dtype == x.dtype
    assert jnp.allclose(out, ref, atol=1e-5, rtol=1e-5), "mismatch vs reference"

    print("KERNEL_OK")
</pallas_src>

<mosaic_0001>
module attributes {stable_mosaic.version = 11 : i64} {
  func.func @linear_autoencoder_kernel(%arg0: i32, %arg1: memref<2x24xf32, #tpu.memory_space<vmem>>, %arg2: memref<24x24xf32, #tpu.memory_space<vmem>>, %arg3: memref<2x24xf32, #tpu.memory_space<vmem>>) attributes {dimension_semantics = [#tpu.dimension_semantics<parallel>], iteration_bounds = array<i64: 1>, scalar_prefetch = 0 : i64, scratch_operands = 0 : i64, tpu.core_type = #tpu.core_type<tc>, window_params = [{transform_indices = @transform_0, window_bounds = array<i64: 2, 24>}, {pipeline_mode = #tpu.pipeline_mode<synchronous>, transform_indices = @transform_1, window_bounds = array<i64: 24, 24>}, {transform_indices = @transform_2, window_bounds = array<i64: 2, 24>}]} {
    %c0 = arith.constant 0 : index
    %c0_0 = arith.constant 0 : index
    %0 = vector.load %arg1[%c0, %c0_0] : memref<2x24xf32, #tpu.memory_space<vmem>>, vector<2x24xf32>
    %c0_1 = arith.constant 0 : index
    %c0_2 = arith.constant 0 : index
    %1 = vector.load %arg2[%c0_1, %c0_2] : memref<24x24xf32, #tpu.memory_space<vmem>>, vector<24x24xf32>
    %cst = arith.constant dense<0.000000e+00> : vector<2x24xf32>
    %2 = tpu.matmul %0, %1, %cst {dimension_numbers = #tpu.dot_dimension_numbers<[1], [0], [0], [1], [0, 0, 1, 1], [], []>} : vector<2x24xf32>, vector<24x24xf32>, vector<2x24xf32> -> vector<2x24xf32>
    %c0_3 = arith.constant 0 : index
    %c0_4 = arith.constant 0 : index
    %3 = vector.load %arg3[%c0_3, %c0_4] : memref<2x24xf32, #tpu.memory_space<vmem>>, vector<2x24xf32>
    tpu.vector_store %arg3[%c0_3, %c0_4], %2 {strides = array<i32>} : memref<2x24xf32, #tpu.memory_space<vmem>>, vector<2x24xf32>,
    return
  }
  func.func @transform_0(%arg0: i32) -> (i32, i32) {
    %c0_i32 = arith.constant 0 : i32
    %c0_i32_0 = arith.constant 0 : i32
    return %arg0, %c0_i32 : i32, i32
  }
  func.func @transform_1(%arg0: i32) -> (i32, i32) {
    %c0_i32 = arith.constant 0 : i32
    %c0_i32_0 = arith.constant 0 : i32
    %c0_i32_1 = arith.constant 0 : i32
    return %c0_i32, %c0_i32_0 : i32, i32
  }
  func.func @transform_2(%arg0: i32) -> (i32, i32) {
    %c0_i32 = arith.constant 0 : i32
    %c0_i32_0 = arith.constant 0 : i32
    return %arg0, %c0_i32 : i32, i32
  }
}

</mosaic_0001>

<bundles_post_ra>
// kernel: linear_autoencoder.1
= control target key start
LH: loop header
LB: loop body
LE: loop exit
PB: predicated region body
PF: predicated region fallthrough
CT: control target
= control target key end

     0   :  { %vm15_vm0 = vcmask 195584   ;;  %vm39_vm1 = vcmask 189440   ;;  %s76_s1 = inlined_call_operand.vmem [shape: f32[24,24], index: 1, kind: input, shape index: {}]   ;;  %s77_s0 = inlined_call_operand.vmem [shape: f32[2,24], index: 0, kind: input, shape index: {}]   ;;  %s78_s2 = inlined_call_operand.vmem [shape: f32[2,24], index: 2, kind: output, shape index: {}]  }
   0x1   :  { %v14_v0 = vld [vmem:[%s76_s1 + $0x10] sm:$0xff]  ;;  %v13_v1 = vld [vmem:[%s76_s1 + $0x8] sm:$0xff]  ;;  %v12_v2 = vld [vmem:[%s76_s1] sm:$0xff] }
   0x2   :  { %32 = vmatpush.msra.mxu0 %v14_v0  ;;  %v11_v3 = vld [vmem:[%s77_s0] sm:$0x3] }
   0x4   :  { %33 = vmatpush.msra.mxu0 %v13_v1 }
   0x6   :  { %34 = vmatpush.msra.mxu0 %v12_v2 }
   0x7   :  { %45 = vmatmul.msk.f32.vlgmr.msra.gmra.mxu0 %vm15_vm0, %v11_v3 }
  0x84   :  { %v36_v4 = vpop.f32.mrf.mxu0 }
  0x85   :  { %40 = vst.msk [vmem:[%s78_s2] sm:$0x3] %vm39_vm1, %v36_v4 }

</bundles_post_ra>
